<compile_context>
chip_gen: v5e
topology: v5e:2x2
jax: 0.10.0
libtpu: 0.0.40
codegen_flags: <defaults>
</compile_context>

<pallas_src>
import numpy as np
import jax
import jax.numpy as jnp
from jax.experimental import pallas as pl
from jax.experimental.pallas import tpu as pltpu


def _divisors(n):
    return [d for d in range(1, n + 1) if n % d == 0]


def _choose_tiles(B, H, W, max_tile_pixels=2048, max_unrolled_rows=64):
    """Pick (rows per tile TH, images per block Bt, interleave chunk CS)."""
    # TH must give a lane-tile TH*W that is a multiple of 128 or the full H*W.
    valid = [t for t in _divisors(H) if (t * W) % 128 == 0]
    if not valid:
        valid = [H]                                   # full extent always legal
    pref = [t for t in valid if t * W <= max_tile_pixels and t <= max_unrolled_rows]
    th = max(pref) if pref else min(valid)

    # Fold several images into one block so tiny feature maps still amortize the
    # ~0.35us per-grid-step overhead.
    bt_cands = [d for d in _divisors(B)
                if d * th <= max_unrolled_rows and d * th * W <= 2 * max_tile_pixels]
    bt = max(bt_cands) if bt_cands else 1

    # v7x megacore: expose >=2 grid steps when the batch axis alone gives one.
    if (B // bt) * ((H * W) // (th * W)) < 2:
        smaller = [t for t in valid if t < th]
        if smaller:
            th = max(smaller)

    # Interleave chunk: whole rows, contraction 2*CS kept <= 256 (MXU depth).
    if W >= 128:
        cs = W
    else:
        gg = max(d for d in _divisors(th) if d * W <= 128)
        cs = gg * W
    return th, bt, cs


def _make_kernel(Bt, C_in, C_out, W, TH, CS, out_dtype, compute_dtype):
    TM = TH * W
    W_seg = min(W, CS)
    n_seg = CS // W_seg
    n_chunks = TM // CS
    two_co = 2 * C_out

    def kernel(x_ref, w_ref, e0_ref, e1_ref, b_ref, o_ref):
        # x_ref : (Bt, C_in, TM)       input pixels (whole rows), lane-dense
        # w_ref : (4*C_out, C_in)      packed weight-norm taps, rows = (d, a, co)
        # e*_ref: (CS, 2*CS)           0/1 routing matrices for the 2j+d interleave
        # b_ref : (2*C_out, 1)         bias replicated over a, f32
        # o_ref : (Bt, C_out, 4*TM)    final NCHW output rows, flattened (2H,2W)
        w = w_ref[...]
        e0 = e0_ref[...]
        e1 = e1_ref[...]
        bias = b_ref[...]
        for bi in range(Bt):
            for c in range(n_chunks):
                x_c = x_ref[bi, :, c * CS:(c + 1) * CS]            # (C_in, CS)
                acc = jnp.dot(w, x_c,
                              preferred_element_type=jnp.float32)  # (4C_out, CS)
                # d=0 / d=1 tap planes (both a's stacked on sublanes).
                p0 = acc[:two_co, :].astype(compute_dtype)
                p1 = acc[two_co:, :].astype(compute_dtype)
                # Route each value to its 2j+d output lane (exact: weights are 0/1).
                z = (jnp.dot(p0, e0, preferred_element_type=jnp.float32)
                     + jnp.dot(p1, e1, preferred_element_type=jnp.float32)
                     + bias)                                        # (2C_out, 2CS)
                z = z.astype(out_dtype)
                # Store interleaved 2W-wide output rows; 2i+a handled here.
                for s in range(n_seg):
                    src0 = c * CS + s * W_seg
                    i_loc, j0 = divmod(src0, W)
                    zg = z[:, s * 2 * W_seg:(s + 1) * 2 * W_seg]    # (2C_out, 2W_seg)
                    for a in range(2):
                        dest = (2 * i_loc + a) * 2 * W + 2 * j0
                        o_ref[bi, :, pl.ds(dest, 2 * W_seg)] = (
                            zg[a * C_out:(a + 1) * C_out, :])
    return kernel


def down_right_shifted_deconv2d_forward(x, v, g, bias, *,
                                        filter_size=(2, 2), stride=(2, 2),
                                        max_tile_pixels=2048,
                                        compute_in_bf16=False):
    """x: [B, C_in, H, W]; v: [C_in, C_out, 2, 2]; g: [C_in]; bias: [C_out].
    Returns [B, C_out, 2H, 2W], matching the PyTorch module forward pass."""
    if tuple(filter_size) != (2, 2) or tuple(stride) != (2, 2):
        # Only the (2,2)/(2,2) configuration used in PixelCNN++ is valid in
        # PyTorch (output_padding=1 requires stride >= 2).
        raise NotImplementedError("only filter_size=(2,2), stride=(2,2)")

    B, C_in, H, W = x.shape
    C_in_w, C_out, kh, kw = v.shape
    assert C_in_w == C_in and (kh, kw) == (2, 2)

    out_dtype = x.dtype
    cdt = jnp.bfloat16 if (compute_in_bf16 and x.dtype == jnp.float32) else x.dtype
    if x.dtype != cdt:
        x = x.astype(cdt)

    # ---- weight norm + tap packing (one-shot, hoisted out of the kernel) ----
    v32 = v.astype(jnp.float32)
    inv_norm = jax.lax.rsqrt(jnp.sum(v32 * v32, axis=(1, 2, 3), keepdims=True))
    w_eff = g.astype(jnp.float32).reshape(-1, 1, 1, 1) * v32 * inv_norm
    # rows ordered (d, a, co): row = d*2*C_out + a*C_out + co
    w_packed = jnp.transpose(w_eff, (3, 2, 1, 0)).reshape(4 * C_out, C_in).astype(cdt)
    bias_z = jnp.tile(bias.astype(jnp.float32), 2).reshape(2 * C_out, 1)

    # ---- tiling ----
    TH, Bt, CS = _choose_tiles(B, H, W, max_tile_pixels)
    TM = TH * W
    W_seg = min(W, CS)

    # ---- 0/1 routing matrices for the in-kernel 2j+d lane interleave ----
    srcs = np.arange(CS)
    gs, jj = np.divmod(srcs, W_seg)
    t0 = gs * (2 * W_seg) + 2 * jj
    E0 = np.zeros((CS, 2 * CS), np.float32)
    E1 = np.zeros((CS, 2 * CS), np.float32)
    E0[srcs, t0] = 1.0
    E1[srcs, t0 + 1] = 1.0
    e0 = jnp.asarray(E0, dtype=cdt)
    e1 = jnp.asarray(E1, dtype=cdt)

    hw = H * W
    x3 = x.reshape(B, C_in, hw)                       # free reshape, stays NCHW
    grid = (B // Bt, hw // TM)

    # ---- VMEM budget (<= 48 MiB, v7x headroom) & cost hint ----
    isz_in = jnp.dtype(cdt).itemsize
    isz_out = jnp.dtype(out_dtype).itemsize
    blk_bytes = Bt * (C_in * TM * isz_in + C_out * 4 * TM * isz_out)
    const_bytes = (4 * C_out * C_in + 2 * CS * 2 * CS) * isz_in + 2 * C_out * 4
    acc_bytes = (4 * C_out * CS + 2 * C_out * 2 * CS) * 4 * 2
    need = 2 * blk_bytes + 2 * const_bytes + acc_bytes + (2 << 20)
    vmem_limit = int(min(48 * 1024 * 1024, max(16 * 1024 * 1024, need)))

    main_flops = 2 * B * hw * C_in * 4 * C_out
    ilv_flops = 16 * B * hw * C_out * CS
    bytes_accessed = int(B * C_in * hw * isz_in + B * C_out * 4 * hw * isz_out
                         + const_bytes)
    cost = pl.CostEstimate(flops=main_flops + ilv_flops, transcendentals=0,
                           bytes_accessed=bytes_accessed)

    kernel = _make_kernel(Bt, C_in, C_out, W, TH, CS, out_dtype, cdt)

    out_flat = pl.pallas_call(
        kernel,
        out_shape=jax.ShapeDtypeStruct((B, C_out, 4 * hw), out_dtype),
        grid_spec=pltpu.PrefetchScalarGridSpec(
            num_scalar_prefetch=0,
            grid=grid,
            in_specs=[
                pl.BlockSpec((Bt, C_in, TM), lambda b, s: (b, 0, s)),
                pl.BlockSpec((4 * C_out, C_in), lambda b, s: (0, 0)),
                pl.BlockSpec((CS, 2 * CS), lambda b, s: (0, 0)),
                pl.BlockSpec((CS, 2 * CS), lambda b, s: (0, 0)),
                pl.BlockSpec((2 * C_out, 1), lambda b, s: (0, 0)),
            ],
            out_specs=pl.BlockSpec((Bt, C_out, 4 * TM), lambda b, s: (b, 0, s)),
        ),
        compiler_params=pltpu.CompilerParams(
            dimension_semantics=("parallel", "parallel"),
            vmem_limit_bytes=vmem_limit),
        cost_estimate=cost,
    )(x3, w_packed, e0, e1, bias_z)

    # (B, C_out, 4*H*W) is exactly (B, C_out, 2H, 2W) in row-major: free reshape.
    return out_flat.reshape(B, C_out, 2 * H, 2 * W)


def init_deconv_params(key, c_in, c_out, filter_size=(2, 2), dtype=jnp.float32):
    """Synthetic init mimicking weight_norm(nn.ConvTranspose2d(c_in, c_out, 2, 2))."""
    kh, kw = filter_size
    kv, kb = jax.random.split(key)
    bound = float(c_in * kh * kw) ** -0.5
    v = jax.random.uniform(kv, (c_in, c_out, kh, kw), dtype, -bound, bound)
    g = jnp.sqrt(jnp.sum(v.astype(jnp.float32) ** 2, axis=(1, 2, 3))).astype(dtype)
    bias = jax.random.uniform(kb, (c_out,), dtype, -bound, bound)
    return v, g, bias


def deconv_reference(x, v, g, bias):
    """Plain-JAX reference: ConvTranspose2d(stride=2, k=2, output_padding=1) + crop."""
    B, C_in, H, W = x.shape
    _, C_out, _, _ = v.shape
    v32 = v.astype(jnp.float32)
    norm = jnp.sqrt(jnp.sum(v32 * v32, axis=(1, 2, 3), keepdims=True))
    w = g.astype(jnp.float32).reshape(-1, 1, 1, 1) * v32 / norm
    y = jnp.einsum("bcij,conm->bonmij", x.astype(jnp.float32), w,
                   precision=jax.lax.Precision.HIGHEST)
    y = jnp.transpose(y, (0, 1, 4, 2, 5, 3)).reshape(B, C_out, 2 * H, 2 * W)
    return y + bias.astype(jnp.float32).reshape(1, -1, 1, 1)


if __name__ == "__main__":
    key = jax.random.PRNGKey(0)

    # Test 1: the reference small shape (multi spatial tile path).
    k_x, k_p, key = jax.random.split(key, 3)
    B, C_in, H, W, C_out = 2, 4, 16, 16, 8
    x = jax.random.normal(k_x, (B, C_in, H, W), jnp.float32)
    v, g, bias = init_deconv_params(k_p, C_in, C_out)
    out = jax.block_until_ready(down_right_shifted_deconv2d_forward(x, v, g, bias))
    ref = deconv_reference(x, v, g, bias)
    assert out.shape == (B, C_out, 2 * H, 2 * W), out.shape
    assert jnp.allclose(out, ref.astype(out.dtype), atol=1e-4, rtol=1e-4), \
        "mismatch vs reference (test 1)"

    # Test 2: tiny feature map path (whole image per tile, batch folded into block).
    k_x2, k_p2, key = jax.random.split(key, 3)
    B2, C_in2, H2, W2, C_out2 = 4, 8, 8, 8, 8
    x2 = jax.random.normal(k_x2, (B2, C_in2, H2, W2), jnp.float32)
    v2, g2, bias2 = init_deconv_params(k_p2, C_in2, C_out2)
    out2 = jax.block_until_ready(
        down_right_shifted_deconv2d_forward(x2, v2, g2, bias2))
    ref2 = deconv_reference(x2, v2, g2, bias2)
    assert out2.shape == (B2, C_out2, 2 * H2, 2 * W2), out2.shape
    assert jnp.allclose(out2, ref2.astype(out2.dtype), atol=1e-4, rtol=1e-4), \
        "mismatch vs reference (test 2)"

    print("KERNEL_OK")
</pallas_src>

<mosaic_0001>
module attributes {stable_mosaic.version = 11 : i64} {
  func.func @kernel(%arg0: i32, %arg1: i32, %arg2: memref<2x4x128xf32, #tpu.memory_space<vmem>>, %arg3: memref<32x4xf32, #tpu.memory_space<vmem>>, %arg4: memref<128x256xf32, #tpu.memory_space<vmem>>, %arg5: memref<128x256xf32, #tpu.memory_space<vmem>>, %arg6: memref<16x1xf32, #tpu.memory_space<vmem>>, %arg7: memref<2x8x512xf32, #tpu.memory_space<vmem>>) attributes {dimension_semantics = [#tpu.dimension_semantics<parallel>, #tpu.dimension_semantics<parallel>], iteration_bounds = array<i64: 1, 2>, scalar_prefetch = 0 : i64, scratch_operands = 0 : i64, tpu.core_type = #tpu.core_type<tc>, window_params = [{transform_indices = @transform_0, window_bounds = array<i64: 2, 4, 128>}, {pipeline_mode = #tpu.pipeline_mode<synchronous>, transform_indices = @transform_1, window_bounds = array<i64: 32, 4>}, {pipeline_mode = #tpu.pipeline_mode<synchronous>, transform_indices = @transform_2, window_bounds = array<i64: 128, 256>}, {pipeline_mode = #tpu.pipeline_mode<synchronous>, transform_indices = @transform_3, window_bounds = array<i64: 128, 256>}, {pipeline_mode = #tpu.pipeline_mode<synchronous>, transform_indices = @transform_4, window_bounds = array<i64: 16, 1>}, {transform_indices = @transform_5, window_bounds = array<i64: 2, 8, 512>}]} {
    %c0 = arith.constant 0 : index
    %c0_0 = arith.constant 0 : index
    %0 = vector.load %arg3[%c0, %c0_0] : memref<32x4xf32, #tpu.memory_space<vmem>>, vector<32x4xf32>
    %c0_1 = arith.constant 0 : index
    %c0_2 = arith.constant 0 : index
    %1 = vector.load %arg4[%c0_1, %c0_2] : memref<128x256xf32, #tpu.memory_space<vmem>>, vector<128x256xf32>
    %c0_3 = arith.constant 0 : index
    %c0_4 = arith.constant 0 : index
    %2 = vector.load %arg5[%c0_3, %c0_4] : memref<128x256xf32, #tpu.memory_space<vmem>>, vector<128x256xf32>
    %c0_5 = arith.constant 0 : index
    %c0_6 = arith.constant 0 : index
    %3 = vector.load %arg6[%c0_5, %c0_6] : memref<16x1xf32, #tpu.memory_space<vmem>>, vector<16x1xf32>
    %c0_7 = arith.constant 0 : index
    %c0_8 = arith.constant 0 : index
    %c0_9 = arith.constant 0 : index
    %4 = vector.load %arg2[%c0_7, %c0_8, %c0_9] : memref<2x4x128xf32, #tpu.memory_space<vmem>>, vector<1x4x128xf32>
    %5 = vector.shape_cast %4 : vector<1x4x128xf32> to vector<4x128xf32>
    %cst = arith.constant dense<0.000000e+00> : vector<32x128xf32>
    %6 = tpu.matmul %0, %5, %cst {dimension_numbers = #tpu.dot_dimension_numbers<[1], [0], [0], [1], [0, 0, 1, 1], [], []>} : vector<32x4xf32>, vector<4x128xf32>, vector<32x128xf32> -> vector<32x128xf32>
    %7 = vector.extract_strided_slice %6 {offsets = [0, 0], sizes = [16, 128], strides = [1, 1]} : vector<32x128xf32> to vector<16x128xf32>
    %8 = vector.extract_strided_slice %6 {offsets = [16, 0], sizes = [16, 128], strides = [1, 1]} : vector<32x128xf32> to vector<16x128xf32>
    %cst_10 = arith.constant dense<0.000000e+00> : vector<16x256xf32>
    %9 = tpu.matmul %7, %1, %cst_10 {dimension_numbers = #tpu.dot_dimension_numbers<[1], [0], [0], [1], [0, 0, 1, 1], [], []>} : vector<16x128xf32>, vector<128x256xf32>, vector<16x256xf32> -> vector<16x256xf32>
    %cst_11 = arith.constant dense<0.000000e+00> : vector<16x256xf32>
    %10 = tpu.matmul %8, %2, %cst_11 {dimension_numbers = #tpu.dot_dimension_numbers<[1], [0], [0], [1], [0, 0, 1, 1], [], []>} : vector<16x128xf32>, vector<128x256xf32>, vector<16x256xf32> -> vector<16x256xf32>
    %11 = arith.addf %9, %10 : vector<16x256xf32>
    %12 = vector.broadcast %3 : vector<16x1xf32> to vector<16x256xf32>
    %13 = arith.addf %11, %12 : vector<16x256xf32>
    %14 = vector.extract_strided_slice %13 {offsets = [0, 0], sizes = [16, 32], strides = [1, 1]} : vector<16x256xf32> to vector<16x32xf32>
    %15 = vector.extract_strided_slice %14 {offsets = [0, 0], sizes = [8, 32], strides = [1, 1]} : vector<16x32xf32> to vector<8x32xf32>
    %c0_12 = arith.constant 0 : index
    %c0_13 = arith.constant 0 : index
    %c0_14 = arith.constant 0 : index
    %16 = vector.load %arg7[%c0_12, %c0_13, %c0_14] : memref<2x8x512xf32, #tpu.memory_space<vmem>>, vector<1x8x32xf32>
    %17 = vector.shape_cast %16 : vector<1x8x32xf32> to vector<8x32xf32>
    %18 = vector.shape_cast %15 : vector<8x32xf32> to vector<1x8x32xf32>
    tpu.vector_store %arg7[%c0_12, %c0_13, %c0_14], %18 {strides = array<i32>} : memref<2x8x512xf32, #tpu.memory_space<vmem>>, vector<1x8x32xf32>,
    %19 = vector.extract_strided_slice %14 {offsets = [8, 0], sizes = [8, 32], strides = [1, 1]} : vector<16x32xf32> to vector<8x32xf32>
    %c0_15 = arith.constant 0 : index
    %c0_16 = arith.constant 0 : index
    %c32 = arith.constant 32 : index
    %20 = vector.load %arg7[%c0_15, %c0_16, %c32] : memref<2x8x512xf32, #tpu.memory_space<vmem>>, vector<1x8x32xf32>
    %21 = vector.shape_cast %20 : vector<1x8x32xf32> to vector<8x32xf32>
    %22 = vector.shape_cast %19 : vector<8x32xf32> to vector<1x8x32xf32>
    tpu.vector_store %arg7[%c0_15, %c0_16, %c32], %22 {strides = array<i32>} : memref<2x8x512xf32, #tpu.memory_space<vmem>>, vector<1x8x32xf32>,
    %23 = vector.extract_strided_slice %13 {offsets = [0, 32], sizes = [16, 32], strides = [1, 1]} : vector<16x256xf32> to vector<16x32xf32>
    %24 = vector.extract_strided_slice %23 {offsets = [0, 0], sizes = [8, 32], strides = [1, 1]} : vector<16x32xf32> to vector<8x32xf32>
    %c0_17 = arith.constant 0 : index
    %c0_18 = arith.constant 0 : index
    %c64 = arith.constant 64 : index
    %25 = vector.load %arg7[%c0_17, %c0_18, %c64] : memref<2x8x512xf32, #tpu.memory_space<vmem>>, vector<1x8x32xf32>
    %26 = vector.shape_cast %25 : vector<1x8x32xf32> to vector<8x32xf32>
    %27 = vector.shape_cast %24 : vector<8x32xf32> to vector<1x8x32xf32>
    tpu.vector_store %arg7[%c0_17, %c0_18, %c64], %27 {strides = array<i32>} : memref<2x8x512xf32, #tpu.memory_space<vmem>>, vector<1x8x32xf32>,
    %28 = vector.extract_strided_slice %23 {offsets = [8, 0], sizes = [8, 32], strides = [1, 1]} : vector<16x32xf32> to vector<8x32xf32>
    %c0_19 = arith.constant 0 : index
    %c0_20 = arith.constant 0 : index
    %c96 = arith.constant 96 : index
    %29 = vector.load %arg7[%c0_19, %c0_20, %c96] : memref<2x8x512xf32, #tpu.memory_space<vmem>>, vector<1x8x32xf32>
    %30 = vector.shape_cast %29 : vector<1x8x32xf32> to vector<8x32xf32>
    %31 = vector.shape_cast %28 : vector<8x32xf32> to vector<1x8x32xf32>
    tpu.vector_store %arg7[%c0_19, %c0_20, %c96], %31 {strides = array<i32>} : memref<2x8x512xf32, #tpu.memory_space<vmem>>, vector<1x8x32xf32>,
    %32 = vector.extract_strided_slice %13 {offsets = [0, 64], sizes = [16, 32], strides = [1, 1]} : vector<16x256xf32> to vector<16x32xf32>
    %33 = vector.extract_strided_slice %32 {offsets = [0, 0], sizes = [8, 32], strides = [1, 1]} : vector<16x32xf32> to vector<8x32xf32>
    %c0_21 = arith.constant 0 : index
    %c0_22 = arith.constant 0 : index
    %c128 = arith.constant 128 : index
    %34 = vector.load %arg7[%c0_21, %c0_22, %c128] : memref<2x8x512xf32, #tpu.memory_space<vmem>>, vector<1x8x32xf32>
    %35 = vector.shape_cast %34 : vector<1x8x32xf32> to vector<8x32xf32>
    %36 = vector.shape_cast %33 : vector<8x32xf32> to vector<1x8x32xf32>
    tpu.vector_store %arg7[%c0_21, %c0_22, %c128], %36 {strides = array<i32>} : memref<2x8x512xf32, #tpu.memory_space<vmem>>, vector<1x8x32xf32>,
    %37 = vector.extract_strided_slice %32 {offsets = [8, 0], sizes = [8, 32], strides = [1, 1]} : vector<16x32xf32> to vector<8x32xf32>
    %c0_23 = arith.constant 0 : index
    %c0_24 = arith.constant 0 : index
    %c160 = arith.constant 160 : index
    %38 = vector.load %arg7[%c0_23, %c0_24, %c160] : memref<2x8x512xf32, #tpu.memory_space<vmem>>, vector<1x8x32xf32>
    %39 = vector.shape_cast %38 : vector<1x8x32xf32> to vector<8x32xf32>
    %40 = vector.shape_cast %37 : vector<8x32xf32> to vector<1x8x32xf32>
    tpu.vector_store %arg7[%c0_23, %c0_24, %c160], %40 {strides = array<i32>} : memref<2x8x512xf32, #tpu.memory_space<vmem>>, vector<1x8x32xf32>,
    %41 = vector.extract_strided_slice %13 {offsets = [0, 96], sizes = [16, 32], strides = [1, 1]} : vector<16x256xf32> to vector<16x32xf32>
    %42 = vector.extract_strided_slice %41 {offsets = [0, 0], sizes = [8, 32], strides = [1, 1]} : vector<16x32xf32> to vector<8x32xf32>
    %c0_25 = arith.constant 0 : index
    %c0_26 = arith.constant 0 : index
    %c192 = arith.constant 192 : index
    %43 = vector.load %arg7[%c0_25, %c0_26, %c192] : memref<2x8x512xf32, #tpu.memory_space<vmem>>, vector<1x8x32xf32>
    %44 = vector.shape_cast %43 : vector<1x8x32xf32> to vector<8x32xf32>
    %45 = vector.shape_cast %42 : vector<8x32xf32> to vector<1x8x32xf32>
    tpu.vector_store %arg7[%c0_25, %c0_26, %c192], %45 {strides = array<i32>} : memref<2x8x512xf32, #tpu.memory_space<vmem>>, vector<1x8x32xf32>,
    %46 = vector.extract_strided_slice %41 {offsets = [8, 0], sizes = [8, 32], strides = [1, 1]} : vector<16x32xf32> to vector<8x32xf32>
    %c0_27 = arith.constant 0 : index
    %c0_28 = arith.constant 0 : index
    %c224 = arith.constant 224 : index
    %47 = vector.load %arg7[%c0_27, %c0_28, %c224] : memref<2x8x512xf32, #tpu.memory_space<vmem>>, vector<1x8x32xf32>
    %48 = vector.shape_cast %47 : vector<1x8x32xf32> to vector<8x32xf32>
    %49 = vector.shape_cast %46 : vector<8x32xf32> to vector<1x8x32xf32>
    tpu.vector_store %arg7[%c0_27, %c0_28, %c224], %49 {strides = array<i32>} : memref<2x8x512xf32, #tpu.memory_space<vmem>>, vector<1x8x32xf32>,
    %50 = vector.extract_strided_slice %13 {offsets = [0, 128], sizes = [16, 32], strides = [1, 1]} : vector<16x256xf32> to vector<16x32xf32>
    %51 = vector.extract_strided_slice %50 {offsets = [0, 0], sizes = [8, 32], strides = [1, 1]} : vector<16x32xf32> to vector<8x32xf32>
    %c0_29 = arith.constant 0 : index
    %c0_30 = arith.constant 0 : index
    %c256 = arith.constant 256 : index
    %52 = vector.load %arg7[%c0_29, %c0_30, %c256] : memref<2x8x512xf32, #tpu.memory_space<vmem>>, vector<1x8x32xf32>
    %53 = vector.shape_cast %52 : vector<1x8x32xf32> to vector<8x32xf32>
    %54 = vector.shape_cast %51 : vector<8x32xf32> to vector<1x8x32xf32>
    tpu.vector_store %arg7[%c0_29, %c0_30, %c256], %54 {strides = array<i32>} : memref<2x8x512xf32, #tpu.memory_space<vmem>>, vector<1x8x32xf32>,
    %55 = vector.extract_strided_slice %50 {offsets = [8, 0], sizes = [8, 32], strides = [1, 1]} : vector<16x32xf32> to vector<8x32xf32>
    %c0_31 = arith.constant 0 : index
    %c0_32 = arith.constant 0 : index
    %c288 = arith.constant 288 : index
    %56 = vector.load %arg7[%c0_31, %c0_32, %c288] : memref<2x8x512xf32, #tpu.memory_space<vmem>>, vector<1x8x32xf32>
    %57 = vector.shape_cast %56 : vector<1x8x32xf32> to vector<8x32xf32>
    %58 = vector.shape_cast %55 : vector<8x32xf32> to vector<1x8x32xf32>
    tpu.vector_store %arg7[%c0_31, %c0_32, %c288], %58 {strides = array<i32>} : memref<2x8x512xf32, #tpu.memory_space<vmem>>, vector<1x8x32xf32>,
    %59 = vector.extract_strided_slice %13 {offsets = [0, 160], sizes = [16, 32], strides = [1, 1]} : vector<16x256xf32> to vector<16x32xf32>
    %60 = vector.extract_strided_slice %59 {offsets = [0, 0], sizes = [8, 32], strides = [1, 1]} : vector<16x32xf32> to vector<8x32xf32>
    %c0_33 = arith.constant 0 : index
    %c0_34 = arith.constant 0 : index
    %c320 = arith.constant 320 : index
    %61 = vector.load %arg7[%c0_33, %c0_34, %c320] : memref<2x8x512xf32, #tpu.memory_space<vmem>>, vector<1x8x32xf32>
    %62 = vector.shape_cast %61 : vector<1x8x32xf32> to vector<8x32xf32>
    %63 = vector.shape_cast %60 : vector<8x32xf32> to vector<1x8x32xf32>
    tpu.vector_store %arg7[%c0_33, %c0_34, %c320], %63 {strides = array<i32>} : memref<2x8x512xf32, #tpu.memory_space<vmem>>, vector<1x8x32xf32>,
    %64 = vector.extract_strided_slice %59 {offsets = [8, 0], sizes = [8, 32], strides = [1, 1]} : vector<16x32xf32> to vector<8x32xf32>
    %c0_35 = arith.constant 0 : index
    %c0_36 = arith.constant 0 : index
    %c352 = arith.constant 352 : index
    %65 = vector.load %arg7[%c0_35, %c0_36, %c352] : memref<2x8x512xf32, #tpu.memory_space<vmem>>, vector<1x8x32xf32>
    %66 = vector.shape_cast %65 : vector<1x8x32xf32> to vector<8x32xf32>
    %67 = vector.shape_cast %64 : vector<8x32xf32> to vector<1x8x32xf32>
    tpu.vector_store %arg7[%c0_35, %c0_36, %c352], %67 {strides = array<i32>} : memref<2x8x512xf32, #tpu.memory_space<vmem>>, vector<1x8x32xf32>,
    %68 = vector.extract_strided_slice %13 {offsets = [0, 192], sizes = [16, 32], strides = [1, 1]} : vector<16x256xf32> to vector<16x32xf32>
    %69 = vector.extract_strided_slice %68 {offsets = [0, 0], sizes = [8, 32], strides = [1, 1]} : vector<16x32xf32> to vector<8x32xf32>
    %c0_37 = arith.constant 0 : index
    %c0_38 = arith.constant 0 : index
    %c384 = arith.constant 384 : index
    %70 = vector.load %arg7[%c0_37, %c0_38, %c384] : memref<2x8x512xf32, #tpu.memory_space<vmem>>, vector<1x8x32xf32>
    %71 = vector.shape_cast %70 : vector<1x8x32xf32> to vector<8x32xf32>
    %72 = vector.shape_cast %69 : vector<8x32xf32> to vector<1x8x32xf32>
    tpu.vector_store %arg7[%c0_37, %c0_38, %c384], %72 {strides = array<i32>} : memref<2x8x512xf32, #tpu.memory_space<vmem>>, vector<1x8x32xf32>,
    %73 = vector.extract_strided_slice %68 {offsets = [8, 0], sizes = [8, 32], strides = [1, 1]} : vector<16x32xf32> to vector<8x32xf32>
    %c0_39 = arith.constant 0 : index
    %c0_40 = arith.constant 0 : index
    %c416 = arith.constant 416 : index
    %74 = vector.load %arg7[%c0_39, %c0_40, %c416] : memref<2x8x512xf32, #tpu.memory_space<vmem>>, vector<1x8x32xf32>
    %75 = vector.shape_cast %74 : vector<1x8x32xf32> to vector<8x32xf32>
    %76 = vector.shape_cast %73 : vector<8x32xf32> to vector<1x8x32xf32>
    tpu.vector_store %arg7[%c0_39, %c0_40, %c416], %76 {strides = array<i32>} : memref<2x8x512xf32, #tpu.memory_space<vmem>>, vector<1x8x32xf32>,
    %77 = vector.extract_strided_slice %13 {offsets = [0, 224], sizes = [16, 32], strides = [1, 1]} : vector<16x256xf32> to vector<16x32xf32>
    %78 = vector.extract_strided_slice %77 {offsets = [0, 0], sizes = [8, 32], strides = [1, 1]} : vector<16x32xf32> to vector<8x32xf32>
    %c0_41 = arith.constant 0 : index
    %c0_42 = arith.constant 0 : index
    %c448 = arith.constant 448 : index
    %79 = vector.load %arg7[%c0_41, %c0_42, %c448] : memref<2x8x512xf32, #tpu.memory_space<vmem>>, vector<1x8x32xf32>
    %80 = vector.shape_cast %79 : vector<1x8x32xf32> to vector<8x32xf32>
    %81 = vector.shape_cast %78 : vector<8x32xf32> to vector<1x8x32xf32>
    tpu.vector_store %arg7[%c0_41, %c0_42, %c448], %81 {strides = array<i32>} : memref<2x8x512xf32, #tpu.memory_space<vmem>>, vector<1x8x32xf32>,
    %82 = vector.extract_strided_slice %77 {offsets = [8, 0], sizes = [8, 32], strides = [1, 1]} : vector<16x32xf32> to vector<8x32xf32>
    %c0_43 = arith.constant 0 : index
    %c0_44 = arith.constant 0 : index
    %c480 = arith.constant 480 : index
    %83 = vector.load %arg7[%c0_43, %c0_44, %c480] : memref<2x8x512xf32, #tpu.memory_space<vmem>>, vector<1x8x32xf32>
    %84 = vector.shape_cast %83 : vector<1x8x32xf32> to vector<8x32xf32>
    %85 = vector.shape_cast %82 : vector<8x32xf32> to vector<1x8x32xf32>
    tpu.vector_store %arg7[%c0_43, %c0_44, %c480], %85 {strides = array<i32>} : memref<2x8x512xf32, #tpu.memory_space<vmem>>, vector<1x8x32xf32>,
    %c1 = arith.constant 1 : index
    %c0_45 = arith.constant 0 : index
    %c0_46 = arith.constant 0 : index
    %86 = vector.load %arg2[%c1, %c0_45, %c0_46] : memref<2x4x128xf32, #tpu.memory_space<vmem>>, vector<1x4x128xf32>
    %87 = vector.shape_cast %86 : vector<1x4x128xf32> to vector<4x128xf32>
    %cst_47 = arith.constant dense<0.000000e+00> : vector<32x128xf32>
    %88 = tpu.matmul %0, %87, %cst_47 {dimension_numbers = #tpu.dot_dimension_numbers<[1], [0], [0], [1], [0, 0, 1, 1], [], []>} : vector<32x4xf32>, vector<4x128xf32>, vector<32x128xf32> -> vector<32x128xf32>
    %89 = vector.extract_strided_slice %88 {offsets = [0, 0], sizes = [16, 128], strides = [1, 1]} : vector<32x128xf32> to vector<16x128xf32>
    %90 = vector.extract_strided_slice %88 {offsets = [16, 0], sizes = [16, 128], strides = [1, 1]} : vector<32x128xf32> to vector<16x128xf32>
    %cst_48 = arith.constant dense<0.000000e+00> : vector<16x256xf32>
    %91 = tpu.matmul %89, %1, %cst_48 {dimension_numbers = #tpu.dot_dimension_numbers<[1], [0], [0], [1], [0, 0, 1, 1], [], []>} : vector<16x128xf32>, vector<128x256xf32>, vector<16x256xf32> -> vector<16x256xf32>
    %cst_49 = arith.constant dense<0.000000e+00> : vector<16x256xf32>
    %92 = tpu.matmul %90, %2, %cst_49 {dimension_numbers = #tpu.dot_dimension_numbers<[1], [0], [0], [1], [0, 0, 1, 1], [], []>} : vector<16x128xf32>, vector<128x256xf32>, vector<16x256xf32> -> vector<16x256xf32>
    %93 = arith.addf %91, %92 : vector<16x256xf32>
    %94 = vector.broadcast %3 : vector<16x1xf32> to vector<16x256xf32>
    %95 = arith.addf %93, %94 : vector<16x256xf32>
    %96 = vector.extract_strided_slice %95 {offsets = [0, 0], sizes = [16, 32], strides = [1, 1]} : vector<16x256xf32> to vector<16x32xf32>
    %97 = vector.extract_strided_slice %96 {offsets = [0, 0], sizes = [8, 32], strides = [1, 1]} : vector<16x32xf32> to vector<8x32xf32>
    %c1_50 = arith.constant 1 : index
    %c0_51 = arith.constant 0 : index
    %c0_52 = arith.constant 0 : index
    %98 = vector.load %arg7[%c1_50, %c0_51, %c0_52] : memref<2x8x512xf32, #tpu.memory_space<vmem>>, vector<1x8x32xf32>
    %99 = vector.shape_cast %98 : vector<1x8x32xf32> to vector<8x32xf32>
    %100 = vector.shape_cast %97 : vector<8x32xf32> to vector<1x8x32xf32>
    tpu.vector_store %arg7[%c1_50, %c0_51, %c0_52], %100 {strides = array<i32>} : memref<2x8x512xf32, #tpu.memory_space<vmem>>, vector<1x8x32xf32>,
    %101 = vector.extract_strided_slice %96 {offsets = [8, 0], sizes = [8, 32], strides = [1, 1]} : vector<16x32xf32> to vector<8x32xf32>
    %c1_53 = arith.constant 1 : index
    %c0_54 = arith.constant 0 : index
    %c32_55 = arith.constant 32 : index
    %102 = vector.load %arg7[%c1_53, %c0_54, %c32_55] : memref<2x8x512xf32, #tpu.memory_space<vmem>>, vector<1x8x32xf32>
    %103 = vector.shape_cast %102 : vector<1x8x32xf32> to vector<8x32xf32>
    %104 = vector.shape_cast %101 : vector<8x32xf32> to vector<1x8x32xf32>
    tpu.vector_store %arg7[%c1_53, %c0_54, %c32_55], %104 {strides = array<i32>} : memref<2x8x512xf32, #tpu.memory_space<vmem>>, vector<1x8x32xf32>,
    %105 = vector.extract_strided_slice %95 {offsets = [0, 32], sizes = [16, 32], strides = [1, 1]} : vector<16x256xf32> to vector<16x32xf32>
    %106 = vector.extract_strided_slice %105 {offsets = [0, 0], sizes = [8, 32], strides = [1, 1]} : vector<16x32xf32> to vector<8x32xf32>
    %c1_56 = arith.constant 1 : index
    %c0_57 = arith.constant 0 : index
    %c64_58 = arith.constant 64 : index
    %107 = vector.load %arg7[%c1_56, %c0_57, %c64_58] : memref<2x8x512xf32, #tpu.memory_space<vmem>>, vector<1x8x32xf32>
    %108 = vector.shape_cast %107 : vector<1x8x32xf32> to vector<8x32xf32>
    %109 = vector.shape_cast %106 : vector<8x32xf32> to vector<1x8x32xf32>
    tpu.vector_store %arg7[%c1_56, %c0_57, %c64_58], %109 {strides = array<i32>} : memref<2x8x512xf32, #tpu.memory_space<vmem>>, vector<1x8x32xf32>,
    %110 = vector.extract_strided_slice %105 {offsets = [8, 0], sizes = [8, 32], strides = [1, 1]} : vector<16x32xf32> to vector<8x32xf32>
    %c1_59 = arith.constant 1 : index
    %c0_60 = arith.constant 0 : index
    %c96_61 = arith.constant 96 : index
    %111 = vector.load %arg7[%c1_59, %c0_60, %c96_61] : memref<2x8x512xf32, #tpu.memory_space<vmem>>, vector<1x8x32xf32>
    %112 = vector.shape_cast %111 : vector<1x8x32xf32> to vector<8x32xf32>
    %113 = vector.shape_cast %110 : vector<8x32xf32> to vector<1x8x32xf32>
    tpu.vector_store %arg7[%c1_59, %c0_60, %c96_61], %113 {strides = array<i32>} : memref<2x8x512xf32, #tpu.memory_space<vmem>>, vector<1x8x32xf32>,
    %114 = vector.extract_strided_slice %95 {offsets = [0, 64], sizes = [16, 32], strides = [1, 1]} : vector<16x256xf32> to vector<16x32xf32>
    %115 = vector.extract_strided_slice %114 {offsets = [0, 0], sizes = [8, 32], strides = [1, 1]} : vector<16x32xf32> to vector<8x32xf32>
    %c1_62 = arith.constant 1 : index
    %c0_63 = arith.constant 0 : index
    %c128_64 = arith.constant 128 : index
    %116 = vector.load %arg7[%c1_62, %c0_63, %c128_64] : memref<2x8x512xf32, #tpu.memory_space<vmem>>, vector<1x8x32xf32>
    %117 = vector.shape_cast %116 : vector<1x8x32xf32> to vector<8x32xf32>
    %118 = vector.shape_cast %115 : vector<8x32xf32> to vector<1x8x32xf32>
    tpu.vector_store %arg7[%c1_62, %c0_63, %c128_64], %118 {strides = array<i32>} : memref<2x8x512xf32, #tpu.memory_space<vmem>>, vector<1x8x32xf32>,
    %119 = vector.extract_strided_slice %114 {offsets = [8, 0], sizes = [8, 32], strides = [1, 1]} : vector<16x32xf32> to vector<8x32xf32>
    %c1_65 = arith.constant 1 : index
    %c0_66 = arith.constant 0 : index
    %c160_67 = arith.constant 160 : index
    %120 = vector.load %arg7[%c1_65, %c0_66, %c160_67] : memref<2x8x512xf32, #tpu.memory_space<vmem>>, vector<1x8x32xf32>
    %121 = vector.shape_cast %120 : vector<1x8x32xf32> to vector<8x32xf32>
    %122 = vector.shape_cast %119 : vector<8x32xf32> to vector<1x8x32xf32>
    tpu.vector_store %arg7[%c1_65, %c0_66, %c160_67], %122 {strides = array<i32>} : memref<2x8x512xf32, #tpu.memory_space<vmem>>, vector<1x8x32xf32>,
    %123 = vector.extract_strided_slice %95 {offsets = [0, 96], sizes = [16, 32], strides = [1, 1]} : vector<16x256xf32> to vector<16x32xf32>
    %124 = vector.extract_strided_slice %123 {offsets = [0, 0], sizes = [8, 32], strides = [1, 1]} : vector<16x32xf32> to vector<8x32xf32>
    %c1_68 = arith.constant 1 : index
    %c0_69 = arith.constant 0 : index
    %c192_70 = arith.constant 192 : index
    %125 = vector.load %arg7[%c1_68, %c0_69, %c192_70] : memref<2x8x512xf32, #tpu.memory_space<vmem>>, vector<1x8x32xf32>
    %126 = vector.shape_cast %125 : vector<1x8x32xf32> to vector<8x32xf32>
    %127 = vector.shape_cast %124 : vector<8x32xf32> to vector<1x8x32xf32>
    tpu.vector_store %arg7[%c1_68, %c0_69, %c192_70], %127 {strides = array<i32>} : memref<2x8x512xf32, #tpu.memory_space<vmem>>, vector<1x8x32xf32>,
    %128 = vector.extract_strided_slice %123 {offsets = [8, 0], sizes = [8, 32], strides = [1, 1]} : vector<16x32xf32> to vector<8x32xf32>
    %c1_71 = arith.constant 1 : index
    %c0_72 = arith.constant 0 : index
    %c224_73 = arith.constant 224 : index
    %129 = vector.load %arg7[%c1_71, %c0_72, %c224_73] : memref<2x8x512xf32, #tpu.memory_space<vmem>>, vector<1x8x32xf32>
    %130 = vector.shape_cast %129 : vector<1x8x32xf32> to vector<8x32xf32>
    %131 = vector.shape_cast %128 : vector<8x32xf32> to vector<1x8x32xf32>
    tpu.vector_store %arg7[%c1_71, %c0_72, %c224_73], %131 {strides = array<i32>} : memref<2x8x512xf32, #tpu.memory_space<vmem>>, vector<1x8x32xf32>,
    %132 = vector.extract_strided_slice %95 {offsets = [0, 128], sizes = [16, 32], strides = [1, 1]} : vector<16x256xf32> to vector<16x32xf32>
    %133 = vector.extract_strided_slice %132 {offsets = [0, 0], sizes = [8, 32], strides = [1, 1]} : vector<16x32xf32> to vector<8x32xf32>
    %c1_74 = arith.constant 1 : index
    %c0_75 = arith.constant 0 : index
    %c256_76 = arith.constant 256 : index
    %134 = vector.load %arg7[%c1_74, %c0_75, %c256_76] : memref<2x8x512xf32, #tpu.memory_space<vmem>>, vector<1x8x32xf32>
    %135 = vector.shape_cast %134 : vector<1x8x32xf32> to vector<8x32xf32>
    %136 = vector.shape_cast %133 : vector<8x32xf32> to vector<1x8x32xf32>
    tpu.vector_store %arg7[%c1_74, %c0_75, %c256_76], %136 {strides = array<i32>} : memref<2x8x512xf32, #tpu.memory_space<vmem>>, vector<1x8x32xf32>,
    %137 = vector.extract_strided_slice %132 {offsets = [8, 0], sizes = [8, 32], strides = [1, 1]} : vector<16x32xf32> to vector<8x32xf32>
    %c1_77 = arith.constant 1 : index
    %c0_78 = arith.constant 0 : index
    %c288_79 = arith.constant 288 : index
    %138 = vector.load %arg7[%c1_77, %c0_78, %c288_79] : memref<2x8x512xf32, #tpu.memory_space<vmem>>, vector<1x8x32xf32>
    %139 = vector.shape_cast %138 : vector<1x8x32xf32> to vector<8x32xf32>
    %140 = vector.shape_cast %137 : vector<8x32xf32> to vector<1x8x32xf32>
    tpu.vector_store %arg7[%c1_77, %c0_78, %c288_79], %140 {strides = array<i32>} : memref<2x8x512xf32, #tpu.memory_space<vmem>>, vector<1x8x32xf32>,
    %141 = vector.extract_strided_slice %95 {offsets = [0, 160], sizes = [16, 32], strides = [1, 1]} : vector<16x256xf32> to vector<16x32xf32>
    %142 = vector.extract_strided_slice %141 {offsets = [0, 0], sizes = [8, 32], strides = [1, 1]} : vector<16x32xf32> to vector<8x32xf32>
    %c1_80 = arith.constant 1 : index
    %c0_81 = arith.constant 0 : index
    %c320_82 = arith.constant 320 : index
    %143 = vector.load %arg7[%c1_80, %c0_81, %c320_82] : memref<2x8x512xf32, #tpu.memory_space<vmem>>, vector<1x8x32xf32>
    %144 = vector.shape_cast %143 : vector<1x8x32xf32> to vector<8x32xf32>
    %145 = vector.shape_cast %142 : vector<8x32xf32> to vector<1x8x32xf32>
    tpu.vector_store %arg7[%c1_80, %c0_81, %c320_82], %145 {strides = array<i32>} : memref<2x8x512xf32, #tpu.memory_space<vmem>>, vector<1x8x32xf32>,
    %146 = vector.extract_strided_slice %141 {offsets = [8, 0], sizes = [8, 32], strides = [1, 1]} : vector<16x32xf32> to vector<8x32xf32>
    %c1_83 = arith.constant 1 : index
    %c0_84 = arith.constant 0 : index
    %c352_85 = arith.constant 352 : index
    %147 = vector.load %arg7[%c1_83, %c0_84, %c352_85] : memref<2x8x512xf32, #tpu.memory_space<vmem>>, vector<1x8x32xf32>
    %148 = vector.shape_cast %147 : vector<1x8x32xf32> to vector<8x32xf32>
    %149 = vector.shape_cast %146 : vector<8x32xf32> to vector<1x8x32xf32>
    tpu.vector_store %arg7[%c1_83, %c0_84, %c352_85], %149 {strides = array<i32>} : memref<2x8x512xf32, #tpu.memory_space<vmem>>, vector<1x8x32xf32>,
    %150 = vector.extract_strided_slice %95 {offsets = [0, 192], sizes = [16, 32], strides = [1, 1]} : vector<16x256xf32> to vector<16x32xf32>
    %151 = vector.extract_strided_slice %150 {offsets = [0, 0], sizes = [8, 32], strides = [1, 1]} : vector<16x32xf32> to vector<8x32xf32>
    %c1_86 = arith.constant 1 : index
    %c0_87 = arith.constant 0 : index
    %c384_88 = arith.constant 384 : index
    %152 = vector.load %arg7[%c1_86, %c0_87, %c384_88] : memref<2x8x512xf32, #tpu.memory_space<vmem>>, vector<1x8x32xf32>
    %153 = vector.shape_cast %152 : vector<1x8x32xf32> to vector<8x32xf32>
    %154 = vector.shape_cast %151 : vector<8x32xf32> to vector<1x8x32xf32>
    tpu.vector_store %arg7[%c1_86, %c0_87, %c384_88], %154 {strides = array<i32>} : memref<2x8x512xf32, #tpu.memory_space<vmem>>, vector<1x8x32xf32>,
    %155 = vector.extract_strided_slice %150 {offsets = [8, 0], sizes = [8, 32], strides = [1, 1]} : vector<16x32xf32> to vector<8x32xf32>
    %c1_89 = arith.constant 1 : index
    %c0_90 = arith.constant 0 : index
    %c416_91 = arith.constant 416 : index
    %156 = vector.load %arg7[%c1_89, %c0_90, %c416_91] : memref<2x8x512xf32, #tpu.memory_space<vmem>>, vector<1x8x32xf32>
    %157 = vector.shape_cast %156 : vector<1x8x32xf32> to vector<8x32xf32>
    %158 = vector.shape_cast %155 : vector<8x32xf32> to vector<1x8x32xf32>
    tpu.vector_store %arg7[%c1_89, %c0_90, %c416_91], %158 {strides = array<i32>} : memref<2x8x512xf32, #tpu.memory_space<vmem>>, vector<1x8x32xf32>,
    %159 = vector.extract_strided_slice %95 {offsets = [0, 224], sizes = [16, 32], strides = [1, 1]} : vector<16x256xf32> to vector<16x32xf32>
    %160 = vector.extract_strided_slice %159 {offsets = [0, 0], sizes = [8, 32], strides = [1, 1]} : vector<16x32xf32> to vector<8x32xf32>
    %c1_92 = arith.constant 1 : index
    %c0_93 = arith.constant 0 : index
    %c448_94 = arith.constant 448 : index
    %161 = vector.load %arg7[%c1_92, %c0_93, %c448_94] : memref<2x8x512xf32, #tpu.memory_space<vmem>>, vector<1x8x32xf32>
    %162 = vector.shape_cast %161 : vector<1x8x32xf32> to vector<8x32xf32>
    %163 = vector.shape_cast %160 : vector<8x32xf32> to vector<1x8x32xf32>
    tpu.vector_store %arg7[%c1_92, %c0_93, %c448_94], %163 {strides = array<i32>} : memref<2x8x512xf32, #tpu.memory_space<vmem>>, vector<1x8x32xf32>,
    %164 = vector.extract_strided_slice %159 {offsets = [8, 0], sizes = [8, 32], strides = [1, 1]} : vector<16x32xf32> to vector<8x32xf32>
    %c1_95 = arith.constant 1 : index
    %c0_96 = arith.constant 0 : index
    %c480_97 = arith.constant 480 : index
    %165 = vector.load %arg7[%c1_95, %c0_96, %c480_97] : memref<2x8x512xf32, #tpu.memory_space<vmem>>, vector<1x8x32xf32>
    %166 = vector.shape_cast %165 : vector<1x8x32xf32> to vector<8x32xf32>
    %167 = vector.shape_cast %164 : vector<8x32xf32> to vector<1x8x32xf32>
    tpu.vector_store %arg7[%c1_95, %c0_96, %c480_97], %167 {strides = array<i32>} : memref<2x8x512xf32, #tpu.memory_space<vmem>>, vector<1x8x32xf32>,
    return
  }
  func.func @transform_0(%arg0: i32, %arg1: i32) -> (i32, i32, i32) {
    %c0_i32 = arith.constant 0 : i32
    %c0_i32_0 = arith.constant 0 : i32
    return %arg0, %c0_i32, %arg1 : i32, i32, i32
  }
  func.func @transform_1(%arg0: i32, %arg1: i32) -> (i32, i32) {
    %c0_i32 = arith.constant 0 : i32
    %c0_i32_0 = arith.constant 0 : i32
    %c0_i32_1 = arith.constant 0 : i32
    return %c0_i32, %c0_i32_0 : i32, i32
  }
  func.func @transform_2(%arg0: i32, %arg1: i32) -> (i32, i32) {
    %c0_i32 = arith.constant 0 : i32
    %c0_i32_0 = arith.constant 0 : i32
    %c0_i32_1 = arith.constant 0 : i32
    return %c0_i32, %c0_i32_0 : i32, i32
  }
  func.func @transform_3(%arg0: i32, %arg1: i32) -> (i32, i32) {
    %c0_i32 = arith.constant 0 : i32
    %c0_i32_0 = arith.constant 0 : i32
    %c0_i32_1 = arith.constant 0 : i32
    return %c0_i32, %c0_i32_0 : i32, i32
  }
  func.func @transform_4(%arg0: i32, %arg1: i32) -> (i32, i32) {
    %c0_i32 = arith.constant 0 : i32
    %c0_i32_0 = arith.constant 0 : i32
    %c0_i32_1 = arith.constant 0 : i32
    return %c0_i32, %c0_i32_0 : i32, i32
  }
  func.func @transform_5(%arg0: i32, %arg1: i32) -> (i32, i32, i32) {
    %c0_i32 = arith.constant 0 : i32
    %c0_i32_0 = arith.constant 0 : i32
    return %arg0, %c0_i32, %arg1 : i32, i32, i32
  }
}

</mosaic_0001>

<bundles_post_ra>
// kernel: tpu_custom_call.1
= control target key start
LH: loop header
LB: loop body
LE: loop exit
PB: predicated region body
PF: predicated region fallthrough
CT: control target
= control target key end

     0   :  { %10 = vsyncpa [#allocation4], 0  ;;  %s1742_s0 = inlined_call_operand.vmem [shape: f32[2,4,256], index: 0, kind: input, shape index: {}]   ;;  %s1743_s1 = inlined_call_operand.vmem [shape: f32[32,4], index: 1, kind: input, shape index: {}]   ;;  %s1744_s2 = inlined_call_operand.hbm [shape: f32[128,256], index: 2, kind: input, shape index: {}]   ;;  %s1745_s3 = inlined_call_operand.hbm [shape: f32[128,256], index: 3, kind: input, shape index: {}]   ;;  %s1746_s4 = inlined_call_operand.vmem [shape: f32[16,1], index: 4, kind: input, shape index: {}]   ;;  %s1747_s5 = inlined_call_operand.hbm [shape: f32[2,8,1024], index: 5, kind: output, shape index: {}]  }
   0x1   :  { %11 = vsyncpa [#allocation7], 0 }
   0x2   :  { %12 = vsyncpa [#allocation5], 0 }
   0x3   :  { %14 = vsyncpa [#allocation5 + $0x1], 0  ;;  %s1237_s18 = smov 0   ;;  %s1239_s19 = smov 0  }
   0x4   :  { %s1241_s20 = smov 0   ;;  %s1243_s21 = smov 0  }
   0x5   :  { %s1245_s22 = smov 0   ;;  %s1247_s23 = smov 0  }
   0x6 LB: > { %s918_s24 = sadd.s32 4294967295, %s1195_s23   ;;  %s919_s25 = sadd.s32 4294967294, %s1195_s23   ;;  %s1195_s23 = sphi %s1247_s23, %s20_s23   ;;  %s1191_s22 = sphi %s1245_s22, %s1757_s22   ;;  %s1187_s21 = sphi %s1243_s21, %s1756_s21   ;;  %s1183_s20 = sphi %s1241_s20, %s1755_s20   ;;  %s1179_s19 = sphi %s1239_s19, %s1754_s19   ;;  %s1175_s18 = sphi %s1237_s18, %s1753_s18  }
   0x7   : > { %s29_s26 = sadd.s32 1, %s1191_s22  ;;  %s41_s27 = sadd.s32 1, %s1183_s20 }
   0x8   : > { %p30_p0 = scmp.ge.s32.totalorder %s29_s26, 2  ;;  %p48_p1 = scmp.ne.s32.totalorder %s1183_s20, %s1179_s19 }
   0x9   : > { %p49_p2 = scmp.eq.s32.totalorder %s1195_s23, 0  ;;  %p164_p3 = scmp.eq.s32.totalorder %s918_s24, 1 }
   0xa   : > { %s1759_s26 = smov (%p30_p0, %s29_s26), 0  ;;  %p169_p6 = scmp.ne.s32.totalorder %s1179_s19, %s1175_s18 }
   0xb   : > { %p1276_p4 = por %p49_p2, %p48_p1  ;;  %p1280_p5 = por %p164_p3, %p48_p1 }
   0xc   : > { %s37_s30 = ssub.s32 %s1191_s22, %s1759_s26  ;;  %p170_p8 = scmp.eq.s32.totalorder %s919_s25, 1 }
   0xd   : > { %p39_p7 = scmp.eq.s32.totalorder %s37_s30, 0  ;;  %p920_p9 = scmp.ge.s32.totalorder %s1195_s23, 1 }
   0xe   : > { %p177_p10 = scmp.lt.s32.totalorder %s1195_s23, 3  ;;  %p1293_p11 = por %p170_p8, %p169_p6 }
   0xf   : > { %s1291_s6 = scalar_select %p39_p7, %s1183_s20, %s41_s27  }
  0x10   : > { %p1297_p12 = pnand %p920_p9, %p177_p10  ;;  %p1301_p13 = scmp.eq.s32.totalorder %s918_s24, 0 }
  0x11   : > { %s191_s12 = sshll.u32 %s1744_s2, 4  ;;  %s1197_s13 = smov [#allocation3]   ;;  %s192_s12 = int_to_ptr.hbm [resolvable:$true] %s191_s12 }
  0x12   : > { %p974_p0 = pneg %p1297_p12  ;;  %s193_s14 = sshll.u32 %s1197_s13, 4  ;;  %s194_s14 = int_to_ptr.vmem [resolvable:$true] %s193_s14 }
  0x13   : > { %s1198_s15 = smov 256   ;;  %s1199_s16 = smov 16  }
  0x14   : > { %p975_p1 = pnand %p1301_p13, %p974_p0  ;;  %s205_s25 = sshll.u32 %s1745_s3, 4  ;;  %s206_s25 = int_to_ptr.hbm [resolvable:$true] %s205_s25 }
  0x15   : > { %s1200_s27 = smov [#allocation6]   ;;  %p923_p2 = scmp.ge.s32.totalorder %s1195_s23, 2 }
  0x16   : > { %977 = dma.hbm_to_vmem [thread:$0]  (!%p975_p1), %s192_s12, 4096, %s194_s14, [#allocation4], %s1198_s15, %s1198_s15, %s1199_s16  }
  0x17   : > { %s207_s30 = sshll.u32 %s1200_s27, 4  ;;  %220 = sbr.rel (%p923_p2) target bundleno = 34 (0x22), region = 32  ;;  %s208_s30 = int_to_ptr.vmem [resolvable:$true] %s207_s30 }
  0x18   : > { %980 = dma.hbm_to_vmem [thread:$0]  (!%p975_p1), %s206_s25, 4096, %s208_s30, [#allocation7], %s1198_s15, %s1198_s15, %s1199_s16  }
  0x1c   : > { %223 = sbr.rel (!%p1276_p4) target bundleno = 34 (0x22), region = 36  ;;  %s225_s10 = sand.u32 (%p1276_p4), 1, %s1183_s20  }
  0x1d   : > { %s925_s11 = sshll.u32 (%p1276_p4), %s1191_s22, 2  ;;  %s924_s12 = sshll.u32 (%p1276_p4), %s225_s10, 3 }
  0x1e   : > { %s232_s17 = scalar_lea.vmem (%p1276_p4), %s1742_s0, %s925_s11  ;;  %s227_s15 = scalar_lea.vmem (%p1276_p4), [#allocation2], %s924_s12 }
  0x1f   : > { %v249_v0 = vld [vmem:[%s232_s17] sm:$0xf] (%p1276_p4)  ;;  %v251_v1 = vld [vmem:[%s232_s17 + $0x8] sm:$0xf] (%p1276_p4) }
  0x20   : > { %250 = vst [vmem:[%s227_s15] sm:$0xf] (%p1276_p4), %v249_v0 }
  0x21   : > { %252 = vst [vmem:[%s227_s15 + $0x4] sm:$0xf] %v251_v1 }
  0x22 PF: > { %283 = sbr.rel (%p1297_p12) target bundleno = 631 (0x277), region = 77  ;;  %s1328_s28 = sand.u32 (!%p1297_p12), 1, %s1179_s19  }
  0x23   : > { %s927_s16 = sshll.u32 (!%p1297_p12), %s1328_s28, 3 }
  0x24   : > { %s1331_s24 = scalar_lea.vmem (!%p1297_p12), [#allocation2], %s927_s16 }
  0x27   : > { %1162 = dma.done.wait (%p1301_p13), [#allocation4], 4096  }
  0x28   : > { %1164 = vsyncadd (%p1301_p13), [#allocation4], 4294963200 }
  0x29   : > { %1166 = dma.done.wait (%p1301_p13), [#allocation7], 4096  }
  0x2a   : > { %1168 = vsyncadd (%p1301_p13), [#allocation7], 4294963200  ;;  %vm410_vm0 = vcmask 1043456   ;;  %vm397_vm1 = vcmask 31744   ;;  %v396_v2 = vld [vmem:[%s1331_s24] sm:$0xf] }
  0x2b   : > { %v1345_v3 = vld [vmem:[%s1743_s1] sm:$0xff]  ;;  %931 = vmatpush.msk.msra.mxu0 %vm410_vm0, %v396_v2  ;;  %v1353_v5 = vld [vmem:[#allocation3 + $0xf8] sm:$0xff]  ;;  %v1355_v6 = vld [vmem:[#allocation3 + $0xe0] sm:$0xff]  ;;  %s930_s16 = sshll.u32 %s1328_s28, 6  ;;  %vm549_vm2 = vcmask 261120   ;;  %s1203_s8 = smov 32  }
  0x2c   : > { %v1348_v4 = vld [vmem:[#allocation3 + $0xf0] sm:$0xff]  ;;  %932 = vmatmul.msk.f32.vlgmr.msra.gmra.mxu0 %vm397_vm1, %v1345_v3  ;;  %v1357_v7 = vld [vmem:[#allocation3 + $0xe8] sm:$0xff]  ;;  %v1363_v9 = vld [vmem:[#allocation3 + $0xd8] sm:$0xff]  ;;  %s1605_s25 = scalar_lea.vmem [#allocation8], %s930_s16  ;;  %s1204_s9 = smov 96   ;;  %vm555_vm3 = vcmask 523520  }
  0x2d   : > { %489 = vmatpush.msra.mxu3 %v1348_v4  ;;  %512 = vmatpush.msrb.mxu0 %v1353_v5  ;;  %v1360_v8 = vld [vmem:[#allocation3 + $0xd0] sm:$0xff]  ;;  %v1366_v10 = vld [vmem:[#allocation3 + $0xc0] sm:$0xff]  ;;  %v1371_v11 = vld [vmem:[%s1743_s1 + $0x8] sm:$0xff]  ;;  %vm561_vm4 = vcmask 785920   ;;  %vm566_vm5 = vcmask 1048320   ;;  %s963_s27 = sshll.u32 %s1187_s21, 5 }
  0x2e   : > { %v1374_v12 = vld [vmem:[#allocation3 + $0xc8] sm:$0xff]  ;;  %v1377_v13 = vld [vmem:[#allocation3 + $0xb0] sm:$0xff]  ;;  %v1381_v15 = vld [vmem:[#allocation6 + $0xf8] sm:$0xff]  ;;  %s811_s11 = scalar_lea.hbm %s1747_s5, %s963_s27  ;;  %s812_s12 = sshll.u32 %s1605_s25, 4  ;;  %s813_s12 = int_to_ptr.vmem [resolvable:$true] %s812_s12 }
  0x2f   : > { %490 = vmatpush.msra.mxu3 %v1355_v6  ;;  %513 = vmatpush.msrb.mxu0 %v1357_v7  ;;  %v1379_v14 = vld [vmem:[#allocation6 + $0xf0] sm:$0xff]  ;;  %v1384_v16 = vld [vmem:[#allocation3 + $0xb8] sm:$0xff]  ;;  %v1387_v17 = vld [vmem:[#allocation6 + $0xe0] sm:$0xff]  ;;  %s814_s13 = sshll.u32 %s811_s11, 4  ;;  %s797_s21 = scalar_lea.sflag [#allocation5], %s1328_s28  ;;  %s815_s13 = int_to_ptr.hbm [resolvable:$true] %s814_s13 }
  0x30   : > { %443 = vmatpush.msra.mxu1 %v1379_v14  ;;  %v1390_v18 = vld [vmem:[#allocation3 + $0xa0] sm:$0xff]  ;;  %466 = vmatpush.msra.mxu2 %v1381_v15  ;;  %v1393_v19 = vld [vmem:[#allocation6 + $0xe8] sm:$0xff]  ;;  %v1400_v21 = vld [vmem:[#allocation6 + $0xd0] sm:$0xff]  ;;  %s1123_s14 = sshra.s32 %s815_s13, 4  ;;  %s1124_s14 = int_to_ptr.hbm [resolvable:$true] %s1123_s14 }
  0x31   : > { %491 = vmatpush.msra.mxu3 %v1360_v8  ;;  %514 = vmatpush.msrb.mxu0 %v1363_v9  ;;  %v1398_v20 = vld [vmem:[#allocation3 + $0xa8] sm:$0xff]  ;;  %v1403_v22 = vld [vmem:[#allocation3 + $0x90] sm:$0xff]  ;;  %v1406_v23 = vld [vmem:[#allocation6 + $0xd8] sm:$0xff]  ;;  %s1125_s17 = scalar_lea.hbm %s1124_s14, 64  ;;  %p1130_p7 = scmp.lt.s32.totalorder %s1124_s14, %s1747_s5 }
  0x32   : > { %444 = vmatpush.msra.mxu1 %v1387_v17  ;;  %v1409_v24 = vld [vmem:[#allocation3 + $0x98] sm:$0xff]  ;;  %467 = vmatpush.msra.mxu2 %v1393_v19  ;;  %v1412_v25 = vld [vmem:[#allocation6 + $0xc0] sm:$0xff]  ;;  %v1418_v27 = vld [vmem:[#allocation6 + $0xc8] sm:$0xff]  ;;  %p1126_p3 = scmp.ne.s32.totalorder %s1124_s14, %s1125_s17 }
  0x33   : > { %492 = vmatpush.msra.mxu3 %v1366_v10  ;;  %515 = vmatpush.msrb.mxu0 %v1374_v12  ;;  %v1415_v26 = vld [vmem:[#allocation3 + $0x80] sm:$0xff]  ;;  %v1421_v28 = vld [vmem:[#allocation3 + $0x88] sm:$0xff]  ;;  %v1424_v29 = vld [vmem:[#allocation6 + $0xb0] sm:$0xff] }
  0x34   : > { %933 = vmatmul.msk.f32.gmra.mxu0 %vm397_vm1, %v1371_v11  ;;  %445 = vmatpush.msra.mxu1 %v1400_v21  ;;  %v1429_v30 = vld [vmem:[%s1743_s1 + $0x10] sm:$0xff]  ;;  %v1432_v31 = vld [vmem:[#allocation3 + $0x70] sm:$0xff]  ;;  %v1436_v32 = vld [vmem:[#allocation3 + $0x78] sm:$0xff]  ;;  %p1127_p4 = pnand %p1126_p3, %p1280_p5 }
  0x35   : > { %493 = vmatpush.msra.mxu3 %v1377_v13  ;;  %516 = vmatpush.msrb.mxu0 %v1384_v16  ;;  %v1439_v33 = vld [vmem:[#allocation6 + $0xb8] sm:$0xff]  ;;  %v1442_v34 = vld [vmem:[#allocation3 + $0x60] sm:$0xff]  ;;  %v1450_v36 = vld [vmem:[#allocation3 + $0x68] sm:$0xff] }
  0x36   : > { %468 = vmatpush.msra.mxu2 %v1406_v23  ;;  %446 = vmatpush.msra.mxu1 %v1412_v25  ;;  %v1445_v35 = vld [vmem:[#allocation6 + $0xa0] sm:$0xff]  ;;  %v1452_v37 = vld [vmem:[#allocation6 + $0xa8] sm:$0xff]  ;;  %v1455_v38 = vld [vmem:[#allocation3 + $0x50] sm:$0xff]  ;;  %p1128_p6 = pneg %p1127_p4 }
  0x37   : > { %494 = vmatpush.msra.mxu3 %v1390_v18  ;;  %517 = vmatpush.msrb.mxu0 %v1398_v20  ;;  %v1458_v39 = vld [vmem:[#allocation6 + $0x90] sm:$0xff]  ;;  %v1461_v40 = vld [vmem:[#allocation3 + $0x58] sm:$0xff]  ;;  %v1467_v42 = vld [vmem:[#allocation3 + $0x40] sm:$0xff] }
  0x38   : > { %469 = vmatpush.msra.mxu2 %v1418_v27  ;;  %447 = vmatpush.msra.mxu1 %v1424_v29  ;;  %v1464_v41 = vld [vmem:[#allocation6 + $0x98] sm:$0xff]  ;;  %v1471_v43 = vld [vmem:[#allocation3 + $0x48] sm:$0xff]  ;;  %v1480_v45 = vld [vmem:[#allocation3 + $0x30] sm:$0xff] }
  0x39   : > { %495 = vmatpush.msra.mxu3 %v1403_v22  ;;  %518 = vmatpush.msrb.mxu0 %v1409_v24  ;;  %v1477_v44 = vld [vmem:[%s1743_s1 + $0x18] sm:$0xff]  ;;  %v1484_v46 = vld [vmem:[#allocation3 + $0x38] sm:$0xff]  ;;  %v1487_v47 = vld [vmem:[#allocation3 + $0x20] sm:$0xff] }
  0x3a   : > { %470 = vmatpush.msra.mxu2 %v1439_v33  ;;  %448 = vmatpush.msra.mxu1 %v1445_v35  ;;  %v1492_v48 = vld [vmem:[#allocation3 + $0x28] sm:$0xff]  ;;  %v1495_v49 = vld [vmem:[#allocation3 + $0x10] sm:$0xff]  ;;  %v1498_v50 = vld [vmem:[#allocation3 + $0x18] sm:$0xff] }
  0x3b   : > { %496 = vmatpush.msra.mxu3 %v1415_v26  ;;  %519 = vmatpush.msrb.mxu0 %v1421_v28  ;;  %v1503_v51 = vld [vmem:[#allocation6 + $0x80] sm:$0xff]  ;;  %v379_v52 = vld [vmem:[#allocation6 + $0x88] sm:$0xff]  ;;  %v1512_v55 = vld [vmem:[#allocation6 + $0x70] sm:$0xff] }
  0x3c   : > { %934 = vmatmul.msk.f32.gmra.mxu0 %vm397_vm1, %v1429_v30  ;;  %471 = vmatpush.msra.mxu2 %v1452_v37  ;;  %v1505_v53 = vld [vmem:[#allocation3] sm:$0xff]  ;;  %v1508_v54 = vld [vmem:[#allocation3 + $0x8] sm:$0xff]  ;;  %v377_v56 = vld [vmem:[#allocation6 + $0x78] sm:$0xff] }
  0x3d   : > { %497 = vmatpush.msra.mxu3 %v1432_v31  ;;  %520 = vmatpush.msrb.mxu0 %v1436_v32  ;;  %v1514_v57 = vld [vmem:[#allocation6 + $0x60] sm:$0xff]  ;;  %v375_v58 = vld [vmem:[#allocation6 + $0x68] sm:$0xff]  ;;  %v1517_v59 = vld [vmem:[#allocation6 + $0x50] sm:$0xff] }
  0x3e   : > { %449 = vmatpush.msra.mxu1 %v1458_v39  ;;  %472 = vmatpush.msra.mxu2 %v1464_v41  ;;  %v373_v60 = vld [vmem:[#allocation6 + $0x58] sm:$0xff]  ;;  %v1525_v61 = vld [vmem:[#allocation6 + $0x40] sm:$0xff]  ;;  %v371_v62 = vld [vmem:[#allocation6 + $0x48] sm:$0xff] }
  0x3f   : > { %498 = vmatpush.msra.mxu3 %v1442_v34  ;;  %521 = vmatpush.msrb.mxu0 %v1450_v36  ;;  %v1530_v63 = vld [vmem:[#allocation6 + $0x30] sm:$0xff]  ;;  %v369_v0 = vld [vmem:[#allocation6 + $0x38] sm:$0xff]  ;;  %v1532_v1 = vld [vmem:[#allocation6 + $0x20] sm:$0xff] }
  0x40   : > { %450 = vmatpush.msra.mxu1 %v1503_v51  ;;  %473 = vmatpush.msra.mxu2 %v379_v52  ;;  %v367_v2 = vld [vmem:[#allocation6 + $0x28] sm:$0xff] }
  0x41   : > { %499 = vmatpush.msra.mxu3 %v1455_v38  ;;  %522 = vmatpush.msrb.mxu0 %v1461_v40 }
  0x42   : > { %451 = vmatpush.msra.mxu1 %v1512_v55  ;;  %474 = vmatpush.msra.mxu2 %v377_v56 }
  0x43   : > { %500 = vmatpush.msra.mxu3 %v1467_v42  ;;  %523 = vmatpush.msrb.mxu0 %v1471_v43 }
  0x44   : > { %935 = vmatmul.msk.f32.gmra.mxu0 %vm397_vm1, %v1477_v44  ;;  %452 = vmatpush.msra.mxu1 %v1514_v57 }
  0x45   : > { %501 = vmatpush.msra.mxu3 %v1480_v45  ;;  %524 = vmatpush.msrb.mxu0 %v1484_v46 }
  0x46   : > { %475 = vmatpush.msra.mxu2 %v375_v58  ;;  %453 = vmatpush.msra.mxu1 %v1517_v59 }
  0x47   : > { %502 = vmatpush.msra.mxu3 %v1487_v47  ;;  %525 = vmatpush.msrb.mxu0 %v1492_v48 }
  0x48   : > { %476 = vmatpush.msra.mxu2 %v373_v60  ;;  %454 = vmatpush.msra.mxu1 %v1525_v61 }
  0x49   : > { %503 = vmatpush.msra.mxu3 %v1495_v49  ;;  %526 = vmatpush.msrb.mxu0 %v1498_v50 }
  0x4a   : > { %477 = vmatpush.msra.mxu2 %v371_v62  ;;  %455 = vmatpush.msra.mxu1 %v1530_v63 }
  0x4b   : > { %504 = vmatpush.msra.mxu3 %v1505_v53  ;;  %527 = vmatpush.msrb.mxu0 %v1508_v54 }
  0x4c   : > { %478 = vmatpush.msra.mxu2 %v369_v0  ;;  %456 = vmatpush.msra.mxu1 %v1532_v1 }
  0x4d   : > { %689 = vmatpush.msra.mxu0 %v1348_v4  ;;  %666 = vmatpush.msrb.mxu3 %v1381_v15  ;;  %v364_v4 = vld [vmem:[#allocation6 + $0x10] sm:$0xff]  ;;  %v1201_v15 = vmov 0  }
  0x4e   : > { %479 = vmatpush.msra.mxu2 %v367_v2  ;;  %457 = vmatpush.msra.mxu1 %v364_v4 }
  0x4f   : > { %690 = vmatpush.msra.mxu0 %v1355_v6  ;;  %667 = vmatpush.msrb.mxu3 %v1393_v19  ;;  %v365_v6 = vld [vmem:[#allocation6 + $0x18] sm:$0xff] }
  0x50   : > { %480 = vmatpush.msra.mxu2 %v365_v6  ;;  %1048 = vset.pattern.permute.xlu0 %v1201_v15 }
  0x51   : > { %691 = vmatpush.msra.mxu0 %v1360_v8  ;;  %668 = vmatpush.msrb.mxu3 %v1406_v23  ;;  %v362_v8 = vld [vmem:[#allocation6] sm:$0xff] }
  0x52   : > { %458 = vmatpush.msra.mxu1 %v362_v8 }
  0x53   : > { %692 = vmatpush.msra.mxu0 %v1366_v10  ;;  %669 = vmatpush.msrb.mxu3 %v1418_v27  ;;  %v363_v10 = vld [vmem:[#allocation6 + $0x8] sm:$0xff] }
  0x54   : > { %481 = vmatpush.msra.mxu2 %v363_v10 }
  0x55   : > { %693 = vmatpush.msra.mxu0 %v1377_v13  ;;  %670 = vmatpush.msrb.mxu3 %v1439_v33  ;;  %v936_v13 = vld [vmem:[%s1331_s24 + $0x4] sm:$0xf]  ;;  %s1202_s24 = smov 64  }
  0x56   : > { %643 = vmatpush.msrb.mxu2 %v1379_v14  ;;  %937 = vmatpush.msk.msrb.mxu1 %vm410_vm0, %v936_v13  ;;  %v394_v14 = vld [vmem:[%s1746_s4] sm:$0xff] }
  0x57   : > { %694 = vmatpush.msra.mxu0 %v1390_v18  ;;  %671 = vmatpush.msrb.mxu3 %v1452_v37  ;;  %v395_v18 = vld [vmem:[%s1746_s4 + $0x8] sm:$0xff] }
  0x58   : > { %644 = vmatpush.msrb.mxu2 %v1387_v17  ;;  %537 = vperm.xlu0 %1048, %v394_v14  }
  0x59   : > { %695 = vmatpush.msra.mxu0 %v1403_v22  ;;  %672 = vmatpush.msrb.mxu3 %v1464_v41 }
  0x5a   : > { %645 = vmatpush.msrb.mxu2 %v1400_v21 }
  0x5b   : > { %696 = vmatpush.msra.mxu0 %v1415_v26  ;;  %673 = vmatpush.msrb.mxu3 %v379_v52 }
  0x5c   : > { %646 = vmatpush.msrb.mxu2 %v1412_v25 }
  0x5d   : > { %697 = vmatpush.msra.mxu0 %v1432_v31  ;;  %674 = vmatpush.msrb.mxu3 %v377_v56 }
  0x5e   : > { %647 = vmatpush.msrb.mxu2 %v1424_v29 }
  0x5f   : > { %698 = vmatpush.msra.mxu0 %v1442_v34  ;;  %675 = vmatpush.msrb.mxu3 %v375_v58 }
  0x60   : > { %648 = vmatpush.msrb.mxu2 %v1445_v35  ;;  %542 = vperm.xlu0 %1048, %v395_v18  }
  0x61   : > { %699 = vmatpush.msra.mxu0 %v1455_v38  ;;  %676 = vmatpush.msrb.mxu3 %v373_v60 }
  0x62   : > { %649 = vmatpush.msrb.mxu2 %v1458_v39 }
  0x63   : > { %700 = vmatpush.msra.mxu0 %v1467_v42  ;;  %677 = vmatpush.msrb.mxu3 %v371_v62 }
  0x64   : > { %650 = vmatpush.msrb.mxu2 %v1503_v51 }
  0x65   : > { %701 = vmatpush.msra.mxu0 %v1480_v45  ;;  %678 = vmatpush.msrb.mxu3 %v369_v0 }
  0x66   : > { %651 = vmatpush.msrb.mxu2 %v1512_v55 }
  0x67   : > { %702 = vmatpush.msra.mxu0 %v1487_v47  ;;  %679 = vmatpush.msrb.mxu3 %v367_v2 }
  0x68   : > { %652 = vmatpush.msrb.mxu2 %v1514_v57 }
  0x69   : > { %703 = vmatpush.msra.mxu0 %v1495_v49  ;;  %680 = vmatpush.msrb.mxu3 %v365_v6 }
  0x6a   : > { %653 = vmatpush.msrb.mxu2 %v1517_v59 }
  0x6b   : > { %704 = vmatpush.msra.mxu0 %v1505_v53  ;;  %681 = vmatpush.msrb.mxu3 %v363_v10 }
  0x6c   : > { %654 = vmatpush.msrb.mxu2 %v1525_v61 }
  0x6e   : > { %655 = vmatpush.msrb.mxu2 %v1530_v63 }
  0x70   : > { %656 = vmatpush.msrb.mxu2 %v1532_v1 }
  0x72   : > { %657 = vmatpush.msrb.mxu2 %v364_v4 }
  0x74   : > { %658 = vmatpush.msrb.mxu2 %v362_v8 }
  0xa9   : > { %v431_v17 = vpop.f32.mrf.mxu0 }
  0xaa   : > { %505 = vmatmul.f32.vlgmr.msra.gmra.mxu3 %v431_v17  ;;  %528 = vmatmul.f32.vlgmr.msrb.gmra.mxu0 %v431_v17 }
  0xb1   : > { %v434_v19 = vpop.f32.mrf.mxu0 }
  0xb2   : > { %508 = vmatmul.f32.gmra.mxu3 %v434_v19  ;;  %531 = vmatmul.f32.gmra.mxu0 %v434_v19 }
  0xb9   : > { %v437_v21 = vpop.f32.mrf.mxu0 }
  0xba   : > { %459 = vmatmul.f32.vlgmr.msra.gmra.mxu1 %v437_v21  ;;  %482 = vmatmul.f32.vlgmr.msra.gmra.mxu2 %v437_v21 }
  0xbb   : > { %712 = vmatpush.msra.mxu1 %v1353_v5 }
  0xbd   : > { %713 = vmatpush.msra.mxu1 %v1357_v7 }
  0xbf   : > { %714 = vmatpush.msra.mxu1 %v1363_v9 }
  0xc1   : > { %v440_v22 = vpop.f32.mrf.mxu0  ;;  %715 = vmatpush.msra.mxu1 %v1374_v12 }
  0xc2   : > { %462 = vmatmul.f32.gmra.mxu1 %v440_v22  ;;  %485 = vmatmul.f32.gmra.mxu2 %v440_v22 }
  0xc3   : > { %716 = vmatpush.msra.mxu1 %v1384_v16 }
  0xc5   : > { %717 = vmatpush.msra.mxu1 %v1398_v20 }
  0xc7   : > { %718 = vmatpush.msra.mxu1 %v1409_v24 }
  0xc9   : > { %719 = vmatpush.msra.mxu1 %v1421_v28 }
  0xca   : > { %938 = vmatmul.msk.f32.vlgmr.msrb.gmra.mxu1 %vm397_vm1, %v1345_v3  ;;  %v1599_v3 = vpop.permute.xlu0 %537 }
  0xcb   : > { %720 = vmatpush.msra.mxu1 %v1436_v32 }
  0xcd   : > { %721 = vmatpush.msra.mxu1 %v1450_v36 }
  0xcf   : > { %722 = vmatpush.msra.mxu1 %v1461_v40 }
  0xd1   : > { %723 = vmatpush.msra.mxu1 %v1471_v43 }
  0xd2   : > { %939 = vmatmul.msk.f32.gmra.mxu1 %vm397_vm1, %v1371_v11  ;;  %v1615_v27 = vpop.permute.xlu0 %542 }
  0xd3   : > { %724 = vmatpush.msra.mxu1 %v1484_v46 }
  0xd5   : > { %725 = vmatpush.msra.mxu1 %v1492_v48 }
  0xd7   : > { %726 = vmatpush.msra.mxu1 %v1498_v50 }
  0xd9   : > { %727 = vmatpush.msra.mxu1 %v1508_v54 }
  0xda   : > { %940 = vmatmul.msk.f32.gmra.mxu1 %vm397_vm1, %v1429_v30 }
  0xe2   : > { %941 = vmatmul.msk.f32.gmra.mxu1 %vm397_vm1, %v1477_v44 }
 0x127   : > { %v529_v12 = vpop.f32.mrf.mxu0 }
 0x12d   : > { %v506_v5 = vpop.f32.mrf.mxu3 }
 0x12f   : > { %v532_v31 = vpop.f32.mrf.mxu0 }
 0x135   : > { %v509_v25 = vpop.f32.mrf.mxu3 }
 0x137   : > { %v460_v7 = vpop.f32.mrf.mxu1 }
 0x138   : > { %v507_v9 = vadd.f32 %v506_v5, %v460_v7 }
 0x13a   : > { %v545_v11 = vadd.f32 %v1599_v3, %v507_v9 }
 0x13c   : > { %568 = vrot.lane.b32.xlu2 %v545_v11, %s1202_s24  ;;  %558 = vrot.lane.b32.xlu1 %v545_v11, %s1203_s8  ;;  %550 = vst.msk [vmem:[%s1605_s25] sm:$0xff] %vm549_vm2, %v545_v11 }
 0x13d   : > { %v483_v16 = vpop.f32.mrf.mxu2 }
 0x13e   : > { %v530_v20 = vadd.f32 %v529_v12, %v483_v16 }
 0x13f   : > { %v463_v23 = vpop.f32.mrf.mxu1 }
 0x140   : > { %v546_v24 = vadd.f32 %v1599_v3, %v530_v20  ;;  %v510_v26 = vadd.f32 %v509_v25, %v463_v23 }
 0x142   : > { %581 = vst.msk [vmem:[%s1605_s25 + $0x10] sm:$0xff] %vm549_vm2, %v546_v24  ;;  %588 = vrot.lane.b32.xlu0 %v546_v24, %s1203_s8  ;;  %v547_v29 = vadd.f32 %v1615_v27, %v510_v26 }
 0x144   : > { %576 = vrot.lane.b32.xlu1 %v545_v11, %s1204_s9  ;;  %596 = vrot.lane.b32.xlu2 %v546_v24, %s1202_s24 }
 0x145   : > { %v486_v30 = vpop.f32.mrf.mxu2 }
 0x146   : > { %v533_v32 = vadd.f32 %v532_v31, %v486_v30 }
 0x147   : > { %v631_v28 = vpop.f32.mrf.mxu1 }
 0x148   : > { %705 = vmatmul.f32.vlgmr.msra.gmra.mxu0 %v631_v28  ;;  %728 = vmatmul.f32.vlgmr.msra.gmra.mxu1 %v631_v28  ;;  %v548_v34 = vadd.f32 %v1615_v27, %v533_v32 }
 0x14a   : > { %572 = vrot.lane.b32.xlu0 %v547_v29, %s1204_s9 }
 0x14c   : > { %604 = vrot.lane.b32.xlu1 %v546_v24, %s1204_s9  ;;  %563 = vrot.lane.b32.xlu2 %v547_v29, %s1202_s24 }
 0x14f   : > { %v634_v33 = vpop.f32.mrf.mxu1 }
 0x150   : > { %708 = vmatmul.f32.gmra.mxu0 %v634_v33  ;;  %731 = vmatmul.f32.gmra.mxu1 %v634_v33 }
 0x154   : > { %583 = vrot.lane.b32.xlu2 %v548_v34, %s1203_s8  ;;  %552 = vrot.lane.b32.xlu1 %v547_v29, %s1203_s8 }
 0x157   : > { %v637_v35 = vpop.f32.mrf.mxu1 }
 0x158   : > { %659 = vmatmul.f32.vlgmr.msrb.gmra.mxu2 %v637_v35  ;;  %682 = vmatmul.f32.vlgmr.msrb.gmra.mxu3 %v637_v35 }
 0x15c   : > { %600 = vrot.lane.b32.xlu2 %v548_v34, %s1204_s9  ;;  %592 = vrot.lane.b32.xlu1 %v548_v34, %s1202_s24 }
 0x15f   : > { %v640_v36 = vpop.f32.mrf.mxu1 }
 0x160   : > { %662 = vmatmul.f32.gmra.mxu2 %v640_v36  ;;  %685 = vmatmul.f32.gmra.mxu3 %v640_v36 }
 0x196   : > { %v569_v37 = vpop.permute.xlu2 %568 }
 0x197   : > { %571 = vst.msk [vmem:[%s1605_s25 + $0x8] sm:$0xff] %vm549_vm2, %v569_v37 }
 0x19e   : > { %v597_v38 = vpop.permute.xlu2 %596 }
 0x19f   : > { %599 = vst.msk [vmem:[%s1605_s25 + $0x18] sm:$0xff] %vm549_vm2, %v597_v38 }
 0x1a6   : > { %v564_v39 = vpop.permute.xlu2 %563 }
 0x1ae   : > { %v559_v40 = vpop.permute.xlu1 %558  ;;  %v584_v41 = vpop.permute.xlu2 %583 }
 0x1af   : > { %586 = vst.msk [vmem:[%s1605_s25 + $0x10] sm:$0xff] %vm555_vm3, %v584_v41 }
 0x1b4   : > { %v589_v42 = vpop.permute.xlu0 %588 }
 0x1b5   : > { %591 = vst.msk [vmem:[%s1605_s25 + $0x10] sm:$0xff] %vm561_vm4, %v589_v42 }
 0x1b6   : > { %v577_v43 = vpop.permute.xlu1 %576  ;;  %v601_v44 = vpop.permute.xlu2 %600 }
 0x1b7   : > { %603 = vst.msk [vmem:[%s1605_s25 + $0x18] sm:$0xff] %vm555_vm3, %v601_v44 }
 0x1bc   : > { %v573_v45 = vpop.permute.xlu0 %572 }
 0x1bd   : > { %575 = vst.msk [vmem:[%s1605_s25 + $0x8] sm:$0xff] %vm555_vm3, %v573_v45 }
 0x1be   : > { %579 = vst.msk [vmem:[%s1605_s25 + $0x8] sm:$0xff] %vm561_vm4, %v577_v43  ;;  %v605_v46 = vpop.permute.xlu1 %604 }
 0x1bf   : > { %580 = vst.msk [vmem:[%s1605_s25 + $0x8] sm:$0xff] %vm566_vm5, %v547_v29 }
 0x1c0   : > { %607 = vst.msk [vmem:[%s1605_s25 + $0x18] sm:$0xff] %vm561_vm4, %v605_v46 }
 0x1c1   : > { %608 = vst.msk [vmem:[%s1605_s25 + $0x18] sm:$0xff] %vm566_vm5, %v548_v34 }
 0x1c5   : > { %v729_v49 = vpop.f32.mrf.mxu1  ;;  %v706_v50 = vpop.f32.mrf.mxu0 }
 0x1c6   : > { %v553_v47 = vpop.permute.xlu1 %552 }
 0x1c7   : > { %556 = vst.msk [vmem:[%s1605_s25] sm:$0xff] %vm555_vm3, %v553_v47 }
 0x1c8   : > { %562 = vst.msk [vmem:[%s1605_s25] sm:$0xff] %vm561_vm4, %v559_v40 }
 0x1c9   : > { %567 = vst.msk [vmem:[%s1605_s25] sm:$0xff] %vm566_vm5, %v564_v39 }
 0x1cd   : > { %v732_v57 = vpop.f32.mrf.mxu1  ;;  %v709_v62 = vpop.f32.mrf.mxu0 }
 0x1ce   : > { %v593_v48 = vpop.permute.xlu1 %592 }
 0x1cf   : > { %595 = vst.msk [vmem:[%s1605_s25 + $0x10] sm:$0xff] %vm566_vm5, %v593_v48 }
 0x1db   : > { %v660_v51 = vpop.f32.mrf.mxu2  ;;  %v683_v52 = vpop.f32.mrf.mxu3 }
 0x1dc   : > { %v707_v53 = vadd.f32 %v706_v50, %v660_v51  ;;  %v730_v54 = vadd.f32 %v729_v49, %v683_v52 }
 0x1de   : > { %v735_v55 = vadd.f32 %v707_v53, %v1599_v3  ;;  %v736_v56 = vadd.f32 %v730_v54, %v1599_v3 }
 0x1e0   : > { %942 = vst.msk [vmem:[%s1605_s25 + $0x20] sm:$0xff] %vm549_vm2, %v735_v55  ;;  %755 = vrot.lane.b32.xlu0 %v735_v55, %s1202_s24  ;;  %747 = vrot.lane.b32.xlu2 %v735_v55, %s1203_s8 }
 0x1e1   : > { %950 = vst.msk [vmem:[%s1605_s25 + $0x30] sm:$0xff] %vm549_vm2, %v736_v56  ;;  %783 = vrot.lane.b32.xlu1 %v736_v56, %s1202_s24 }
 0x1e3   : > { %v686_v58 = vpop.f32.mrf.mxu3  ;;  %v663_v61 = vpop.f32.mrf.mxu2 }
 0x1e4   : > { %v733_v59 = vadd.f32 %v732_v57, %v686_v58  ;;  %v710_v63 = vadd.f32 %v709_v62, %v663_v61 }
 0x1e6   : > { %v738_v60 = vadd.f32 %v733_v59, %v1615_v27  ;;  %v737_v0 = vadd.f32 %v710_v63, %v1615_v27 }
 0x1e8   : > { %763 = vrot.lane.b32.xlu0 %v735_v55, %s1204_s9  ;;  %770 = vrot.lane.b32.xlu2 %v738_v60, %s1203_s8 }
 0x1e9   : > { %775 = vrot.lane.b32.xlu1 %v736_v56, %s1203_s8 }
 0x1f0   : > { %742 = vrot.lane.b32.xlu0 %v737_v0, %s1203_s8  ;;  %791 = vrot.lane.b32.xlu2 %v736_v56, %s1204_s9 }
 0x1f1   : > { %759 = vrot.lane.b32.xlu1 %v737_v0, %s1204_s9 }
 0x1f8   : > { %787 = vrot.lane.b32.xlu0 %v738_v60, %s1204_s9 }
 0x1f9   : > { %779 = vrot.lane.b32.xlu1 %v738_v60, %s1202_s24 }
 0x200   : > { %751 = vrot.lane.b32.xlu0 %v737_v0, %s1202_s24  ;;  %s1129_s24 = scalar_lea.hbm %s1747_s5, 128 }
 0x201   : > { %p1131_p8 = scmp.lt.s32.totalorder %s1129_s24, %s1125_s17 }
 0x203   : > { %p1132_p9 = por %p1131_p8, %p1130_p7 }
 0x205   : > { %p1133_p10 = pnand %p1132_p9, %p1128_p6 }
 0x23a   : > { %v748_v1 = vpop.permute.xlu2 %747 }
 0x242   : > { %v771_v2 = vpop.permute.xlu2 %770 }
 0x243   : > { %951 = vst.msk [vmem:[%s1605_s25 + $0x30] sm:$0xff] %vm555_vm3, %v771_v2 }
 0x24a   : > { %v792_v17 = vpop.permute.xlu2 %791 }
 0x252   : > { %v756_v4 = vpop.permute.xlu0 %755 }
 0x253   : > { %946 = vst.msk [vmem:[%s1605_s25 + $0x28] sm:$0xff] %vm549_vm2, %v756_v4  ;;  %v784_v6 = vpop.permute.xlu1 %783 }
 0x254   : > { %954 = vst.msk [vmem:[%s1605_s25 + $0x38] sm:$0xff] %vm549_vm2, %v784_v6 }
 0x25a   : > { %v764_v8 = vpop.permute.xlu0 %763 }
 0x25b   : > { %v776_v10 = vpop.permute.xlu1 %775 }
 0x25c   : > { %952 = vst.msk [vmem:[%s1605_s25 + $0x30] sm:$0xff] %vm561_vm4, %v776_v10 }
 0x262   : > { %v743_v13 = vpop.permute.xlu0 %742 }
 0x263   : > { %943 = vst.msk [vmem:[%s1605_s25 + $0x20] sm:$0xff] %vm555_vm3, %v743_v13  ;;  %v760_v14 = vpop.permute.xlu1 %759 }
 0x264   : > { %944 = vst.msk [vmem:[%s1605_s25 + $0x20] sm:$0xff] %vm561_vm4, %v748_v1 }
 0x265   : > { %947 = vst.msk [vmem:[%s1605_s25 + $0x28] sm:$0xff] %vm555_vm3, %v760_v14 }
 0x266   : > { %948 = vst.msk [vmem:[%s1605_s25 + $0x28] sm:$0xff] %vm561_vm4, %v764_v8 }
 0x267   : > { %949 = vst.msk [vmem:[%s1605_s25 + $0x28] sm:$0xff] %vm566_vm5, %v737_v0 }
 0x26a   : > { %v788_v15 = vpop.permute.xlu0 %787 }
 0x26b   : > { %955 = vst.msk [vmem:[%s1605_s25 + $0x38] sm:$0xff] %vm555_vm3, %v788_v15  ;;  %v780_v18 = vpop.permute.xlu1 %779 }
 0x26c   : > { %956 = vst.msk [vmem:[%s1605_s25 + $0x38] sm:$0xff] %vm561_vm4, %v792_v17 }
 0x26d   : > { %957 = vst.msk [vmem:[%s1605_s25 + $0x38] sm:$0xff] %vm566_vm5, %v738_v60 }
 0x26e   : > { %953 = vst.msk [vmem:[%s1605_s25 + $0x30] sm:$0xff] %vm566_vm5, %v780_v18 }
 0x272   : > { %v752_v19 = vpop.permute.xlu0 %751 }
 0x273   : > { %945 = vst.msk [vmem:[%s1605_s25 + $0x20] sm:$0xff] %vm566_vm5, %v752_v19 }
 0x274   : > { %1136 = shalt.err (!%p1133_p10)
}
 0x275   : > { %s1205_s28 = smov 512   ;;  %s1206_s25 = smov 1024  }
 0x276   : > { %972 = dma.vmem_to_hbm [thread:$0]  (%p1280_p5), %s813_s12, 1024, %s815_s13, %s797_s21, %s1205_s28, %s1206_s25, %s1203_s8  }
 0x277 PF: > { %s829_s30 = sand.u32 1, %s1175_s18   ;;  %p982_p12 = pnand %p923_p2, %p1293_p11 }
 0x278   : > { %s830_s10 = scalar_lea.sflag [#allocation5], %s829_s30 }
 0x279   : > { %p983_p13 = pneg %p982_p12 }
 0x27b   : > { %1170 = dma.done.wait (%p983_p13), %s830_s10, 1024  }
 0x27c   : > { %1172 = vsyncadd (%p983_p13), %s830_s10, 4294966272  ;;  %s20_s23 = sadd.s32 1, %s1195_s23   ;;  %s1753_s18 = smov %s1179_s19 }
 0x27d   : > { %p17_p0 = scmp.ge.s32.totalorder %s20_s23, 4   ;;  %s1754_s19 = smov %s1183_s20 }
 0x27e   : > { %s1755_s20 = smov %s1291_s6  ;;  %s1756_s21 = smov %s1191_s22 }
 0x27f   : > { %s1757_s22 = smov %s1759_s26  ;;  %19 = sbr.rel (!%p17_p0) target bundleno = 6 (0x6), region = 132 }
 0x284   :  { %836 = vsyncpa [#allocation4], 1 }
 0x285   :  { %838 = vsyncpa [#allocation4 + $0x1], 1 }
 0x286   :  { %839 = vsyncpa [#allocation7], 1 }
 0x287   :  { %840 = vsyncpa [#allocation5], 1 }
 0x288   :  { %842 = vsyncpa [#allocation5 + $0x1], 1 }

</bundles_post_ra>
